<compile_context>
chip_gen: v6e
topology: v6e:2x2x1
jax: 0.10.0
libtpu: 0.0.40
codegen_flags: <defaults>
</compile_context>

<pallas_src>
import jax
import jax.numpy as jnp
from jax.experimental import pallas as pl
from jax.experimental.pallas import tpu as pltpu


def _round_up(x, m):
    return (x + m - 1) // m * m


def _conv_pool_kernel(p_ref, w_ref, b_ref, o_ref):
    """Fused conv-as-matmul + 2x2 max-pool + bias + ReLU for one M-tile.

    p_ref : (4, TM, Kp)  bf16 im2col patches; leading axis = pool-window offset
    w_ref : (Kp, Cp)     bf16 conv weight (resident across the grid)
    b_ref : (1, Cp)      f32  bias (zero in padded columns)
    o_ref : (TM, Cp)     f32  pooled output tile
    """
    g, tm, kp = p_ref.shape
    # Single MXU pass over all four pool offsets at once (one LHS stream).
    y = jnp.dot(p_ref[...].reshape(g * tm, kp), w_ref[...],
                preferred_element_type=jnp.float32)            # (4*TM, Cp) f32
    # 2x2 max-pool == elementwise max over the four offsets (3 VPU maxes).
    ymax = jnp.maximum(jnp.maximum(y[0 * tm:1 * tm], y[1 * tm:2 * tm]),
                       jnp.maximum(y[2 * tm:3 * tm], y[3 * tm:4 * tm]))
    # Bias + ReLU hoisted after the pool (bias is identical across offsets, ReLU monotone).
    o_ref[...] = jnp.maximum(ymax + b_ref[...], 0.0)


def conv_relu_pool_block(x_nhwc, w_oihw, b, kernel_size, *, tm_target=512):
    """One Conv2d(valid, stride 1) -> ReLU -> MaxPool2d(2,2) block (NHWC in/out)."""
    N, H, W, Cin = x_nhwc.shape
    Cout = w_oihw.shape[0]
    K = kernel_size
    H1, W1 = H - K + 1, W - K + 1        # conv 'valid' output size
    Ho, Wo = H1 // 2, W1 // 2            # maxpool(2,2) floors (extra row/col dropped)
    M = N * Ho * Wo
    Kdim = K * K * Cin

    # Lane/sublane-aligned padded dims: 128 lanes; 16 sublanes for bf16 LHS tiles.
    Kp = _round_up(Kdim, 128)
    Cp = _round_up(Cout, 128)
    TM = min(tm_target, _round_up(M, 16))
    Mp = _round_up(M, TM)

    # im2col (XLA glue): patches[n, r, c, kh, kw, ci] = x[n, r+kh, c+kw, ci]
    # TODO(synk): build the patches in-kernel from an NHWC slab (and fuse both conv
    # blocks into one pallas_call) to cut the K*K wrapper-side HBM inflation.
    patches = jnp.stack(
        [jnp.stack([x_nhwc[:, kh:kh + H1, kw:kw + W1, :] for kw in range(K)], axis=3)
         for kh in range(K)],
        axis=3)                                               # (N, H1, W1, K, K, Cin)

    def pooled(i, j):
        p = patches[:, i:i + 2 * Ho:2, j:j + 2 * Wo:2]        # (N, Ho, Wo, K, K, Cin)
        return p.reshape(M, Kdim)

    # One LHS array for all four pool-window offsets: (4, M, Kdim), then pad + bf16.
    p4 = jnp.stack([pooled(0, 0), pooled(0, 1), pooled(1, 0), pooled(1, 1)], axis=0)
    p4 = jnp.pad(p4, ((0, 0), (0, Mp - M), (0, Kp - Kdim))).astype(jnp.bfloat16)

    # PyTorch weight (Cout, Cin, K, K) -> (kh, kw, cin, cout) -> (Kdim, Cout), zero-padded.
    w_mat = jnp.transpose(w_oihw, (2, 3, 1, 0)).reshape(Kdim, Cout)
    w_mat = jnp.pad(w_mat, ((0, Kp - Kdim), (0, Cp - Cout))).astype(jnp.bfloat16)
    b_row = jnp.pad(b.reshape(1, Cout), ((0, 0), (0, Cp - Cout))).astype(jnp.float32)

    out = pl.pallas_call(
        _conv_pool_kernel,
        out_shape=jax.ShapeDtypeStruct((Mp, Cp), jnp.float32),
        grid=(Mp // TM,),
        in_specs=[
            pl.BlockSpec((4, TM, Kp), lambda i: (0, i, 0)),   # patch tile, streamed over M
            pl.BlockSpec((Kp, Cp), lambda i: (0, 0)),          # weight stays resident
            pl.BlockSpec((1, Cp), lambda i: (0, 0)),           # bias stays resident
        ],
        out_specs=pl.BlockSpec((TM, Cp), lambda i: (i, 0)),
        compiler_params=pltpu.CompilerParams(
            dimension_semantics=("parallel",),                 # megacore sharding on v7x
            vmem_limit_bytes=32 * 1024 * 1024,                 # fits v5e/v6e/v7x budgets
        ),
    )(p4, w_mat, b_row)

    return out[:M, :Cout].reshape(N, Ho, Wo, Cout)


def simple_cnn_conv_blocks(x_nchw, params, kernel_size):
    """Forward pass equivalent to SimpleCNNContainerConvBlocks.forward (NCHW in/out)."""
    w1, b1, w2, b2 = params
    x = jnp.transpose(x_nchw, (0, 2, 3, 1))     # NCHW -> NHWC
    x = conv_relu_pool_block(x, w1, b1, kernel_size)
    x = conv_relu_pool_block(x, w2, b2, kernel_size)
    return jnp.transpose(x, (0, 3, 1, 2))       # NHWC -> NCHW (PyTorch convention)


def _reference(x_nchw, params, K):
    """Pure-JAX f32 reference (same semantics as the PyTorch module)."""
    w1, b1, w2, b2 = params

    def block(x, w, b):
        y = jax.lax.conv_general_dilated(
            x, w, window_strides=(1, 1), padding="VALID",
            dimension_numbers=("NCHW", "OIHW", "NCHW"))
        y = jax.nn.relu(y + b[None, :, None, None])
        y = jax.lax.reduce_window(y, -jnp.inf, jax.lax.max,
                                  (1, 1, 2, 2), (1, 1, 2, 2), "VALID")
        return y

    return block(block(x_nchw, w1, b1), w2, b2)


if __name__ == "__main__":
    key = jax.random.PRNGKey(0)
    k1, k2, k3, k4, k5 = jax.random.split(key, 5)

    # Module config: SimpleCNNContainerConvBlocks(input_channel=4, num_filters=[8,16], kernel_size=3)
    input_channel, num_filters, K = 4, [8, 16], 3
    N, H, W = 2, 16, 16

    x = jax.random.normal(k1, (N, input_channel, H, W), jnp.float32)
    # Deterministic synthetic parameters (shapes per nn.Conv2d in __init__).
    w1 = 0.1 * jax.random.normal(k2, (num_filters[0], input_channel, K, K), jnp.float32)
    b1 = 0.1 * jax.random.normal(k3, (num_filters[0],), jnp.float32)
    w2 = 0.1 * jax.random.normal(k4, (num_filters[1], num_filters[0], K, K), jnp.float32)
    b2 = 0.1 * jax.random.normal(k5, (num_filters[1],), jnp.float32)
    params = (w1, b1, w2, b2)

    out = jax.block_until_ready(simple_cnn_conv_blocks(x, params, K))
    ref = jax.block_until_ready(_reference(x, params, K))

    # (2,4,16,16) -conv3-> (2,8,14,14) -pool-> (2,8,7,7) -conv3-> (2,16,5,5) -pool-> (2,16,2,2)
    assert out.shape == (N, num_filters[1], 2, 2), out.shape
    # bf16 MXU operands with f32 accumulation vs f32 reference -> slightly looser tolerance.
    assert jnp.allclose(out, ref, atol=2e-2, rtol=2e-2), float(jnp.max(jnp.abs(out - ref)))
    print("KERNEL_OK")
</pallas_src>

<mosaic_0001>
module attributes {stable_mosaic.version = 11 : i64} {
  func.func @_conv_pool_kernel(%arg0: i32, %arg1: memref<4x112x128xbf16, #tpu.memory_space<vmem>>, %arg2: memref<128x128xbf16, #tpu.memory_space<vmem>>, %arg3: memref<1x128xf32, #tpu.memory_space<vmem>>, %arg4: memref<112x128xf32, #tpu.memory_space<vmem>>) attributes {dimension_semantics = [#tpu.dimension_semantics<parallel>], iteration_bounds = array<i64: 1>, scalar_prefetch = 0 : i64, scratch_operands = 0 : i64, tpu.core_type = #tpu.core_type<tc>, window_params = [{transform_indices = @transform_0, window_bounds = array<i64: 4, 112, 128>}, {pipeline_mode = #tpu.pipeline_mode<synchronous>, transform_indices = @transform_1, window_bounds = array<i64: 128, 128>}, {pipeline_mode = #tpu.pipeline_mode<synchronous>, transform_indices = @transform_2, window_bounds = array<i64: 1, 128>}, {transform_indices = @transform_3, window_bounds = array<i64: 112, 128>}]} {
    %c0 = arith.constant 0 : index
    %c0_0 = arith.constant 0 : index
    %c0_1 = arith.constant 0 : index
    %0 = vector.load %arg1[%c0, %c0_0, %c0_1] : memref<4x112x128xbf16, #tpu.memory_space<vmem>>, vector<4x112x128xbf16>
    %1 = vector.shape_cast %0 : vector<4x112x128xbf16> to vector<448x128xbf16>
    %c0_2 = arith.constant 0 : index
    %c0_3 = arith.constant 0 : index
    %2 = vector.load %arg2[%c0_2, %c0_3] : memref<128x128xbf16, #tpu.memory_space<vmem>>, vector<128x128xbf16>
    %cst = arith.constant dense<0.000000e+00> : vector<448x128xf32>
    %3 = tpu.matmul %1, %2, %cst {dimension_numbers = #tpu.dot_dimension_numbers<[1], [0], [0], [1], [0, 0, 1, 1], [], []>} : vector<448x128xbf16>, vector<128x128xbf16>, vector<448x128xf32> -> vector<448x128xf32>
    %4 = vector.extract_strided_slice %3 {offsets = [0, 0], sizes = [112, 128], strides = [1, 1]} : vector<448x128xf32> to vector<112x128xf32>
    %5 = vector.extract_strided_slice %3 {offsets = [112, 0], sizes = [112, 128], strides = [1, 1]} : vector<448x128xf32> to vector<112x128xf32>
    %6 = arith.maximumf %4, %5 : vector<112x128xf32>
    %7 = vector.extract_strided_slice %3 {offsets = [224, 0], sizes = [112, 128], strides = [1, 1]} : vector<448x128xf32> to vector<112x128xf32>
    %8 = vector.extract_strided_slice %3 {offsets = [336, 0], sizes = [112, 128], strides = [1, 1]} : vector<448x128xf32> to vector<112x128xf32>
    %9 = arith.maximumf %7, %8 : vector<112x128xf32>
    %10 = arith.maximumf %6, %9 : vector<112x128xf32>
    %c0_4 = arith.constant 0 : index
    %c0_5 = arith.constant 0 : index
    %11 = vector.load %arg3[%c0_4, %c0_5] : memref<1x128xf32, #tpu.memory_space<vmem>>, vector<1x128xf32>
    %12 = vector.broadcast %11 : vector<1x128xf32> to vector<112x128xf32>
    %13 = arith.addf %10, %12 : vector<112x128xf32>
    %cst_6 = arith.constant 0.000000e+00 : f32
    %14 = vector.broadcast %cst_6 : f32 to vector<112x128xf32>
    %15 = arith.maximumf %13, %14 : vector<112x128xf32>
    %c0_7 = arith.constant 0 : index
    %c0_8 = arith.constant 0 : index
    %16 = vector.load %arg4[%c0_7, %c0_8] : memref<112x128xf32, #tpu.memory_space<vmem>>, vector<112x128xf32>
    tpu.vector_store %arg4[%c0_7, %c0_8], %15 {strides = array<i32>} : memref<112x128xf32, #tpu.memory_space<vmem>>, vector<112x128xf32>,
    return
  }
  func.func @transform_0(%arg0: i32) -> (i32, i32, i32) {
    %c0_i32 = arith.constant 0 : i32
    %c0_i32_0 = arith.constant 0 : i32
    %c0_i32_1 = arith.constant 0 : i32
    return %c0_i32, %arg0, %c0_i32_0 : i32, i32, i32
  }
  func.func @transform_1(%arg0: i32) -> (i32, i32) {
    %c0_i32 = arith.constant 0 : i32
    %c0_i32_0 = arith.constant 0 : i32
    %c0_i32_1 = arith.constant 0 : i32
    return %c0_i32, %c0_i32_0 : i32, i32
  }
  func.func @transform_2(%arg0: i32) -> (i32, i32) {
    %c0_i32 = arith.constant 0 : i32
    %c0_i32_0 = arith.constant 0 : i32
    %c0_i32_1 = arith.constant 0 : i32
    return %c0_i32, %c0_i32_0 : i32, i32
  }
  func.func @transform_3(%arg0: i32) -> (i32, i32) {
    %c0_i32 = arith.constant 0 : i32
    %c0_i32_0 = arith.constant 0 : i32
    return %arg0, %c0_i32 : i32, i32
  }
}

</mosaic_0001>

<bundles_post_ra>
// kernel: tpu_custom_call.1
= control target key start
LH: loop header
LB: loop body
LE: loop exit
PB: predicated region body
PF: predicated region fallthrough
CT: control target
= control target key end

     0   :  { %8 = vsyncpa [#allocation3], 0  ;;  %s1071_s0 = inlined_call_operand.hbm [shape: bf16[4,112,128], index: 0, kind: input, shape index: {}]   ;;  %s1072_s1 = inlined_call_operand.hbm [shape: bf16[128,128], index: 1, kind: input, shape index: {}]   ;;  %s1073_s2 = inlined_call_operand.vmem [shape: f32[1,128], index: 2, kind: input, shape index: {}]   ;;  %s1074_s3 = inlined_call_operand.hbm [shape: f32[112,128], index: 3, kind: output, shape index: {}]  }
   0x1   :  { %9 = vsyncpa [#allocation6], 0 }
   0x2   :  { %10 = vsyncpa [#allocation4], 0  ;;  %s968_s12 = smov [#allocation2]  }
   0x3   :  { %s16_s13 = sshll.u32 %s968_s12, 4  ;;  %s17_s13 = int_to_ptr.vmem [resolvable:$true] %s16_s13 }
   0x4   :  { %s910_s14 = scalar_lea.vmem %s17_s13, 3584  ;;  %p915_p1 = scmp.lt.s32.totalorder %s17_s13, %s17_s13 }
   0x5   :  { %p911_p0 = scmp.ne.s32.totalorder %s17_s13, %s910_s14  ;;  %p916_p2 = scmp.lt.s32.totalorder %s910_s14, %s910_s14 }
   0x7   :  { %p917_p3 = por %p916_p2, %p915_p1 }
   0x9   :  { %p918_p4 = pnand %p917_p3, %p911_p0 }
   0xb   :  { %921 = shalt.err (!%p918_p4)
}
   0xc   :  { %s969_s15 = smov 64   ;;  %s970_s16 = smov 4  }
   0xd   :  { %22 = dma.hbm_to_vmem [thread:$0]  %s1071_s0, 3584, %s17_s13, [#allocation3], %s969_s15, %s969_s15, %s970_s16  }
   0xe   :  { %s971_s19 = smov [#allocation5]  }
   0xf   :  { %s28_s20 = sshll.u32 %s971_s19, 4  ;;  %s29_s20 = int_to_ptr.vmem [resolvable:$true] %s28_s20 }
  0x10   :  { %s930_s21 = scalar_lea.vmem %s29_s20, 1024  ;;  %p935_p6 = scmp.lt.s32.totalorder %s29_s20, %s29_s20 }
  0x11   :  { %p931_p5 = scmp.ne.s32.totalorder %s29_s20, %s930_s21  ;;  %p936_p7 = scmp.lt.s32.totalorder %s930_s21, %s930_s21 }
  0x13   :  { %p937_p8 = por %p936_p7, %p935_p6 }
  0x15   :  { %p938_p9 = pnand %p937_p8, %p931_p5 }
  0x17   :  { %941 = shalt.err (!%p938_p9)
}
  0x18   :  { %34 = dma.hbm_to_vmem [thread:$0]  %s1072_s1, 1024, %s29_s20, [#allocation6], %s969_s15, %s969_s15, %s970_s16  }
  0x19   :  { %962 = dma.done.wait [#allocation3], 3584  }
  0x1a   :  { %963 = vsyncadd [#allocation3], 4294963712 }
  0x1b   :  { %964 = dma.done.wait [#allocation6], 1024  }
  0x1c   :  { %965 = vsyncadd [#allocation6], 4294966272  ;;  %v866_v0 = vld [vmem:[#allocation5 + $0x38] sm:$0xff]   ;;  %v867_v1 = vld [vmem:[#allocation5 + $0x30] sm:$0xff]  }
  0x1d   :  { %771 = vmatprep.subr.bf16.mxu0 %v866_v0  ;;  %843 = vmatprep.subr.bf16.mxu1 %v866_v0  ;;  %v868_v2 = vld [vmem:[#allocation5 + $0x28] sm:$0xff]   ;;  %v869_v3 = vld [vmem:[#allocation5 + $0x20] sm:$0xff]   ;;  %v875_v5 = vld [vmem:[#allocation2 + $0x70] sm:$0xff]  }
  0x1e   :  { %772 = vmatpush3.bf16.msra.mxu0 %v866_v0  ;;  %851 = vmatpush3.bf16.msra.mxu1 %v866_v0  ;;  %v874_v4 = vld [vmem:[#allocation2] sm:$0xff]   ;;  %v870_v6 = vld [vmem:[#allocation5 + $0x18] sm:$0xff]   ;;  %v871_v7 = vld [vmem:[#allocation5 + $0x10] sm:$0xff]  }
  0x1f   :  { %773 = vmatprep.subr.bf16.mxu0 %v867_v1  ;;  %844 = vmatprep.subr.bf16.mxu1 %v867_v1  ;;  %v872_v8 = vld [vmem:[#allocation5 + $0x8] sm:$0xff]   ;;  %v873_v9 = vld [vmem:[#allocation5] sm:$0xff]   ;;  %v877_v11 = vld [vmem:[#allocation2 + $0x78] sm:$0xff]  }
  0x20   :  { %787 = vmatprep.mubr.bf16.mxu0 %v874_v4  ;;  %815 = vmatprep.mubr.bf16.mxu1 %v875_v5  ;;  %v876_v10 = vld [vmem:[#allocation2 + $0x8] sm:$0xff]   ;;  %v878_v12 = vld [vmem:[#allocation2 + $0x10] sm:$0xff]   ;;  %v879_v13 = vld [vmem:[#allocation2 + $0x80] sm:$0xff]  }
  0x21   :  { %v880_v14 = vld [vmem:[#allocation2 + $0x18] sm:$0xff]   ;;  %v881_v15 = vld [vmem:[#allocation2 + $0x88] sm:$0xff]   ;;  %v882_v16 = vld [vmem:[#allocation2 + $0x20] sm:$0xff]  }
  0x22   :  { %774 = vmatpush3.bf16.msra.mxu0 %v867_v1  ;;  %852 = vmatpush3.bf16.msra.mxu1 %v867_v1  ;;  %v883_v17 = vld [vmem:[#allocation2 + $0x90] sm:$0xff]   ;;  %v884_v18 = vld [vmem:[#allocation2 + $0x28] sm:$0xff]   ;;  %v885_v19 = vld [vmem:[#allocation2 + $0x98] sm:$0xff]  }
  0x23   :  { %775 = vmatprep.subr.bf16.mxu0 %v868_v2  ;;  %845 = vmatprep.subr.bf16.mxu1 %v868_v2  ;;  %v886_v20 = vld [vmem:[#allocation2 + $0x30] sm:$0xff]   ;;  %v887_v21 = vld [vmem:[#allocation2 + $0xa0] sm:$0xff]   ;;  %v888_v22 = vld [vmem:[#allocation2 + $0x38] sm:$0xff]  }
  0x24   :  { %v889_v23 = vld [vmem:[#allocation2 + $0xa8] sm:$0xff]   ;;  %v890_v24 = vld [vmem:[#allocation2 + $0x40] sm:$0xff]   ;;  %v891_v25 = vld [vmem:[#allocation2 + $0xb0] sm:$0xff]  }
  0x25   :  { %v892_v26 = vld [vmem:[#allocation2 + $0x48] sm:$0xff]   ;;  %v893_v27 = vld [vmem:[#allocation2 + $0xb8] sm:$0xff]   ;;  %v894_v28 = vld [vmem:[#allocation2 + $0x50] sm:$0xff]  }
  0x26   :  { %776 = vmatpush3.bf16.msra.mxu0 %v868_v2  ;;  %853 = vmatpush3.bf16.msra.mxu1 %v868_v2  ;;  %v895_v29 = vld [vmem:[#allocation2 + $0xc0] sm:$0xff]   ;;  %v896_v30 = vld [vmem:[#allocation2 + $0x58] sm:$0xff]   ;;  %v897_v31 = vld [vmem:[#allocation2 + $0xc8] sm:$0xff]  }
  0x27   :  { %777 = vmatprep.subr.bf16.mxu0 %v869_v3  ;;  %846 = vmatprep.subr.bf16.mxu1 %v869_v3  ;;  %v898_v32 = vld [vmem:[#allocation2 + $0x60] sm:$0xff]   ;;  %v899_v33 = vld [vmem:[#allocation2 + $0xd0] sm:$0xff]   ;;  %v900_v34 = vld [vmem:[#allocation2 + $0x68] sm:$0xff]  }
  0x28   :  { %v901_v35 = vld [vmem:[#allocation2 + $0xd8] sm:$0xff]   ;;  %v1028_v0 = vld [vmem:[%s1073_s2] ss:$0 sm:$0xff]  ;;  %s972_s2 = smov [#allocation7]  }
  0x29   :  { %s685_s24 = sshll.u32 %s972_s2, 4  ;;  %s686_s24 = int_to_ptr.vmem [resolvable:$true] %s685_s24 }
  0x2a   :  { %778 = vmatpush3.bf16.msra.mxu0 %v869_v3  ;;  %854 = vmatpush3.bf16.msra.mxu1 %v869_v3  ;;  %s942_s25 = scalar_lea.vmem %s686_s24, 1792  ;;  %p947_p11 = scmp.lt.s32.totalorder %s686_s24, %s686_s24 }
  0x2b   :  { %779 = vmatprep.subr.bf16.mxu0 %v870_v6  ;;  %847 = vmatprep.subr.bf16.mxu1 %v870_v6  ;;  %p943_p10 = scmp.ne.s32.totalorder %s686_s24, %s942_s25  ;;  %p948_p12 = scmp.lt.s32.totalorder %s942_s25, %s942_s25 }
  0x2d   :  { %p949_p13 = por %p948_p12, %p947_p11 }
  0x2e   :  { %780 = vmatpush3.bf16.msra.mxu0 %v870_v6  ;;  %855 = vmatpush3.bf16.msra.mxu1 %v870_v6 }
  0x2f   :  { %781 = vmatprep.subr.bf16.mxu0 %v871_v7  ;;  %848 = vmatprep.subr.bf16.mxu1 %v871_v7  ;;  %p950_p0 = pnand %p949_p13, %p943_p10 }
  0x32   :  { %782 = vmatpush3.bf16.msra.mxu0 %v871_v7  ;;  %856 = vmatpush3.bf16.msra.mxu1 %v871_v7 }
  0x33   :  { %783 = vmatprep.subr.bf16.mxu0 %v872_v8  ;;  %849 = vmatprep.subr.bf16.mxu1 %v872_v8 }
  0x36   :  { %784 = vmatpush3.bf16.msra.mxu0 %v872_v8  ;;  %857 = vmatpush3.bf16.msra.mxu1 %v872_v8 }
  0x37   :  { %785 = vmatprep.subr.bf16.mxu0 %v873_v9  ;;  %850 = vmatprep.subr.bf16.mxu1 %v873_v9 }
  0x3a   :  { %786 = vmatpush3.bf16.msra.mxu0 %v873_v9  ;;  %858 = vmatpush3.bf16.msra.mxu1 %v873_v9 }
  0x3d   :  { %788 = vmatmul.mubr.bf16.vlgmr.msra.gmra.mxu0 %v876_v10  ;;  %816 = vmatmul.mubr.bf16.vlgmr.msra.gmra.mxu1 %v877_v11 }
  0x3e   :  { %791 = vmatprep.mubr.bf16.mxu0 %v878_v12  ;;  %819 = vmatprep.mubr.bf16.mxu1 %v879_v13 }
  0x45   :  { %792 = vmatmul.mubr.bf16.gmra.mxu0 %v880_v14  ;;  %820 = vmatmul.mubr.bf16.gmra.mxu1 %v881_v15 }
  0x46   :  { %795 = vmatprep.mubr.bf16.mxu0 %v882_v16  ;;  %823 = vmatprep.mubr.bf16.mxu1 %v883_v17 }
  0x4d   :  { %796 = vmatmul.mubr.bf16.gmra.mxu0 %v884_v18  ;;  %824 = vmatmul.mubr.bf16.gmra.mxu1 %v885_v19 }
  0x4e   :  { %799 = vmatprep.mubr.bf16.mxu0 %v886_v20  ;;  %827 = vmatprep.mubr.bf16.mxu1 %v887_v21 }
  0x55   :  { %800 = vmatmul.mubr.bf16.gmra.mxu0 %v888_v22  ;;  %828 = vmatmul.mubr.bf16.gmra.mxu1 %v889_v23 }
  0x56   :  { %803 = vmatprep.mubr.bf16.mxu0 %v890_v24  ;;  %831 = vmatprep.mubr.bf16.mxu1 %v891_v25 }
  0x5d   :  { %804 = vmatmul.mubr.bf16.gmra.mxu0 %v892_v26  ;;  %832 = vmatmul.mubr.bf16.gmra.mxu1 %v893_v27 }
  0x5e   :  { %807 = vmatprep.mubr.bf16.mxu0 %v894_v28  ;;  %835 = vmatprep.mubr.bf16.mxu1 %v895_v29 }
  0x65   :  { %808 = vmatmul.mubr.bf16.gmra.mxu0 %v896_v30  ;;  %836 = vmatmul.mubr.bf16.gmra.mxu1 %v897_v31 }
  0x66   :  { %811 = vmatprep.mubr.bf16.mxu0 %v898_v32  ;;  %839 = vmatprep.mubr.bf16.mxu1 %v899_v33 }
  0x6d   :  { %812 = vmatmul.mubr.bf16.gmra.mxu0 %v900_v34  ;;  %840 = vmatmul.mubr.bf16.gmra.mxu1 %v901_v35 }
  0xfd   :  { %v789_v36 = vpop.f32.mrf.mxu0  ;;  %v817_v37 = vpop.f32.mrf.mxu1 }
  0xff   :  { %v366_v38 = vpop.f32.mrf.mxu0  ;;  %v478_v39 = vpop.f32.mrf.mxu1 }
 0x101   :  { %v1001_v40 = vpop.f32.mrf.mxu0  ;;  %v1003_v41 = vpop.f32.mrf.mxu1 }
 0x103   :  { %v369_v42 = vpop.f32.mrf.mxu0  ;;  %v481_v43 = vpop.f32.mrf.mxu1 }
 0x105   :  { %v1005_v44 = vpop.f32.mrf.mxu0  ;;  %v1007_v45 = vpop.f32.mrf.mxu1 }
 0x107   :  { %v382_v46 = vpop.f32.mrf.mxu0  ;;  %v494_v47 = vpop.f32.mrf.mxu1 }
 0x109   :  { %v1009_v48 = vpop.f32.mrf.mxu0  ;;  %v1011_v49 = vpop.f32.mrf.mxu1 }
 0x10b   :  { %v385_v50 = vpop.f32.mrf.mxu0  ;;  %v497_v51 = vpop.f32.mrf.mxu1 }
 0x10d   :  { %v1013_v52 = vpop.f32.mrf.mxu0  ;;  %v1015_v53 = vpop.f32.mrf.mxu1 }
 0x10f   :  { %v398_v54 = vpop.f32.mrf.mxu0  ;;  %v510_v55 = vpop.f32.mrf.mxu1 }
 0x111   :  { %v1017_v56 = vpop.f32.mrf.mxu0  ;;  %v1019_v57 = vpop.f32.mrf.mxu1 }
 0x113   :  { %v1021_v58 = vpop.f32.mrf.mxu0  ;;  %v1023_v59 = vpop.f32.mrf.mxu1 }
 0x115   :  { %v801_v60 = vpop.f32.mrf.mxu0  ;;  %v829_v61 = vpop.f32.mrf.mxu1 }
 0x116   :  { %v589_v62 = vmax.f32 %v366_v38, %v801_v60  ;;  %v603_v63 = vmax.f32 %v478_v39, %v829_v61 }
 0x117   :  { %v1030_v1 = vpop.f32.mrf.mxu0  ;;  %v1032_v2 = vpop.f32.mrf.mxu1 }
 0x118   :  { %v617_v3 = vmax.f32 %v589_v62, %v603_v63 }
 0x119   :  { %v802_v4 = vpop.f32.mrf.mxu0  ;;  %v830_v5 = vpop.f32.mrf.mxu1 }
 0x11a   :  { %v638_v6 = vadd.f32 %v1028_v0, %v617_v3  ;;  %v590_v7 = vmax.f32 %v369_v42, %v802_v4  ;;  %v604_v8 = vmax.f32 %v481_v43, %v830_v5 }
 0x11b   :  { %v1035_v9 = vpop.f32.mrf.mxu0  ;;  %v1037_v10 = vpop.f32.mrf.mxu1 }
 0x11c   :  { %v652_v11 = vmax.f32 %v638_v6, 0.0  ;;  %v618_v12 = vmax.f32 %v590_v7, %v604_v8 }
 0x11d   :  { %v805_v13 = vpop.f32.mrf.mxu0  ;;  %v833_v14 = vpop.f32.mrf.mxu1 }
 0x11e   :  { %666 = vst [vmem:[#allocation7] sm:$0xff] %v652_v11  ;;  %v639_v15 = vadd.f32 %v1028_v0, %v618_v12  ;;  %v593_v16 = vmax.f32 %v382_v46, %v805_v13  ;;  %v607_v17 = vmax.f32 %v494_v47, %v833_v14 }
 0x11f   :  { %v430_v18 = vpop.f32.mrf.mxu0  ;;  %v542_v19 = vpop.f32.mrf.mxu1 }
 0x120   :  { %v653_v20 = vmax.f32 %v639_v15, 0.0  ;;  %v621_v21 = vmax.f32 %v593_v16, %v607_v17  ;;  %v591_v22 = vmax.f32 %v789_v36, %v430_v18  ;;  %v605_v23 = vmax.f32 %v817_v37, %v542_v19 }
 0x121   :  { %v806_v24 = vpop.f32.mrf.mxu0  ;;  %v834_v25 = vpop.f32.mrf.mxu1 }
 0x122   :  { %667 = vst [vmem:[#allocation7 + $0x8] sm:$0xff] %v653_v20  ;;  %v642_v26 = vadd.f32 %v1028_v0, %v621_v21  ;;  %v619_v27 = vmax.f32 %v591_v22, %v605_v23  ;;  %v594_v28 = vmax.f32 %v385_v50, %v806_v24  ;;  %v608_v29 = vmax.f32 %v497_v51, %v834_v25 }
 0x123   :  { %v433_v30 = vpop.f32.mrf.mxu0  ;;  %v545_v31 = vpop.f32.mrf.mxu1 }
 0x124   :  { %v656_v32 = vmax.f32 %v642_v26, 0.0  ;;  %v640_v33 = vadd.f32 %v1028_v0, %v619_v27  ;;  %v622_v34 = vmax.f32 %v594_v28, %v608_v29  ;;  %v592_v35 = vmax.f32 %v1001_v40, %v433_v30 }
 0x125   :  { %v606_v38 = vmax.f32 %v1003_v41, %v545_v31  ;;  %v809_v36 = vpop.f32.mrf.mxu0  ;;  %v837_v37 = vpop.f32.mrf.mxu1 }
 0x126   :  { %670 = vst [vmem:[#allocation7 + $0x20] sm:$0xff] %v656_v32  ;;  %v654_v39 = vmax.f32 %v640_v33, 0.0  ;;  %v643_v42 = vadd.f32 %v1028_v0, %v622_v34  ;;  %v597_v43 = vmax.f32 %v398_v54, %v809_v36  ;;  %v611_v46 = vmax.f32 %v510_v55, %v837_v37 }
 0x127   :  { %v620_v47 = vmax.f32 %v592_v35, %v606_v38  ;;  %v446_v50 = vpop.f32.mrf.mxu0  ;;  %v558_v51 = vpop.f32.mrf.mxu1 }
 0x128   :  { %668 = vst [vmem:[#allocation7 + $0x10] sm:$0xff] %v654_v39  ;;  %v657_v60 = vmax.f32 %v643_v42, 0.0  ;;  %v625_v61 = vmax.f32 %v597_v43, %v611_v46  ;;  %v595_v62 = vmax.f32 %v1005_v44, %v446_v50  ;;  %v609_v40 = vmax.f32 %v1007_v45, %v558_v51 }
 0x129   :  { %v641_v41 = vadd.f32 %v1028_v0, %v620_v47  ;;  %v810_v63 = vpop.f32.mrf.mxu0  ;;  %v838_v3 = vpop.f32.mrf.mxu1 }
 0x12a   :  { %671 = vst [vmem:[#allocation7 + $0x28] sm:$0xff] %v657_v60  ;;  %v646_v4 = vadd.f32 %v1028_v0, %v625_v61  ;;  %v623_v5 = vmax.f32 %v595_v62, %v609_v40  ;;  %v598_v54 = vmax.f32 %v1021_v58, %v810_v63  ;;  %v612_v55 = vmax.f32 %v1023_v59, %v838_v3 }
 0x12b   :  { %v655_v6 = vmax.f32 %v641_v41, 0.0  ;;  %v449_v7 = vpop.f32.mrf.mxu0  ;;  %v561_v8 = vpop.f32.mrf.mxu1 }
 0x12c   :  { %v660_v11 = vmax.f32 %v646_v4, 0.0  ;;  %v644_v44 = vadd.f32 %v1028_v0, %v623_v5  ;;  %v626_v12 = vmax.f32 %v598_v54, %v612_v55  ;;  %v596_v45 = vmax.f32 %v1009_v48, %v449_v7 }
 0x12d   :  { %669 = vst [vmem:[#allocation7 + $0x18] sm:$0xff] %v655_v6  ;;  %v610_v13 = vmax.f32 %v1011_v49, %v561_v8  ;;  %v813_v14 = vpop.f32.mrf.mxu0  ;;  %v841_v15 = vpop.f32.mrf.mxu1 }
 0x12e   :  { %674 = vst [vmem:[#allocation7 + $0x40] sm:$0xff] %v660_v11  ;;  %v658_v16 = vmax.f32 %v644_v44, 0.0  ;;  %v647_v58 = vadd.f32 %v1028_v0, %v626_v12  ;;  %v601_v59 = vmax.f32 %v1030_v1, %v813_v14  ;;  %v615_v17 = vmax.f32 %v1032_v2, %v841_v15 }
 0x12f   :  { %v624_v18 = vmax.f32 %v596_v45, %v610_v13  ;;  %v462_v19 = vpop.f32.mrf.mxu0  ;;  %v574_v20 = vpop.f32.mrf.mxu1 }
 0x130   :  { %672 = vst [vmem:[#allocation7 + $0x30] sm:$0xff] %v658_v16  ;;  %v661_v21 = vmax.f32 %v647_v58, 0.0  ;;  %v629_v22 = vmax.f32 %v601_v59, %v615_v17  ;;  %v599_v48 = vmax.f32 %v1013_v52, %v462_v19  ;;  %v613_v49 = vmax.f32 %v1015_v53, %v574_v20 }
 0x131   :  { %v645_v23 = vadd.f32 %v1028_v0, %v624_v18  ;;  %v814_v24 = vpop.f32.mrf.mxu0  ;;  %v842_v25 = vpop.f32.mrf.mxu1 }
 0x132   :  { %675 = vst [vmem:[#allocation7 + $0x48] sm:$0xff] %v661_v21  ;;  %v650_v26 = vadd.f32 %v1028_v0, %v629_v22  ;;  %v627_v1 = vmax.f32 %v599_v48, %v613_v49  ;;  %v602_v2 = vmax.f32 %v1035_v9, %v814_v24  ;;  %v616_v27 = vmax.f32 %v1037_v10, %v842_v25 }
 0x133   :  { %v659_v28 = vmax.f32 %v645_v23, 0.0  ;;  %v465_v29 = vpop.f32.mrf.mxu0  ;;  %v577_v30 = vpop.f32.mrf.mxu1 }
 0x134   :  { %v664_v31 = vmax.f32 %v650_v26, 0.0  ;;  %v648_v52 = vadd.f32 %v1028_v0, %v627_v1  ;;  %v630_v32 = vmax.f32 %v602_v2, %v616_v27  ;;  %v600_v53 = vmax.f32 %v1017_v56, %v465_v29 }
 0x135   :  { %673 = vst [vmem:[#allocation7 + $0x38] sm:$0xff] %v659_v28  ;;  %v614_v33 = vmax.f32 %v1019_v57, %v577_v30 }
 0x136   :  { %678 = vst [vmem:[#allocation7 + $0x60] sm:$0xff] %v664_v31  ;;  %v662_v34 = vmax.f32 %v648_v52, 0.0  ;;  %v651_v35 = vadd.f32 %v1028_v0, %v630_v32 }
 0x137   :  { %v628_v38 = vmax.f32 %v600_v53, %v614_v33 }
 0x138   :  { %676 = vst [vmem:[#allocation7 + $0x50] sm:$0xff] %v662_v34  ;;  %v665_v9 = vmax.f32 %v651_v35, 0.0 }
 0x139   :  { %v649_v10 = vadd.f32 %v1028_v0, %v628_v38 }
 0x13a   :  { %679 = vst [vmem:[#allocation7 + $0x68] sm:$0xff] %v665_v9 }
 0x13b   :  { %v663_v36 = vmax.f32 %v649_v10, 0.0 }
 0x13d   :  { %677 = vst [vmem:[#allocation7 + $0x58] sm:$0xff] %v663_v36 }
 0x13e   :  { %953 = shalt.err (!%p950_p0)
}
 0x13f   :  { %s973_s26 = smov 128   ;;  %s974_s27 = smov 8  }
 0x140   :  { %691 = dma.vmem_to_hbm [thread:$0]  %s686_s24, 1792, %s1074_s3, [#allocation4], %s973_s26, %s973_s26, %s974_s27  }
 0x141   :  { %966 = dma.done.wait [#allocation4], 1792  }
 0x142   :  { %967 = vsyncadd [#allocation4], 4294965504 }
 0x143   :  { %695 = vsyncpa [#allocation3], 1 }
 0x144   :  { %696 = vsyncpa [#allocation6], 1 }
 0x145   :  { %697 = vsyncpa [#allocation4], 1 }

</bundles_post_ra>
